<compile_context>
chip_gen: v6e
topology: v6e:2x2x1
jax: 0.10.0
libtpu: 0.0.40
codegen_flags: <defaults>
</compile_context>

<pallas_src>
import functools

import jax
import jax.numpy as jnp
from jax.experimental import pallas as pl
from jax.experimental.pallas import tpu as pltpu


def _round_up(x, m):
    return ((x + m - 1) // m) * m


def _cdiv(a, b):
    return -(-a // b)


# -----------------------------------------------------------------------------
# Per-generation profile & tile selection.
# -----------------------------------------------------------------------------
def _chip_profile():
    kind = ""
    try:
        kind = jax.devices()[0].device_kind.lower()
    except Exception:
        pass
    is_v7x = "v7" in kind

    vmem_cap = None
    try:
        vmem_cap = int(pltpu.get_tpu_info().vmem_capacity_bytes)
    except Exception:
        vmem_cap = None
    if vmem_cap is None:
        if is_v7x:
            vmem_cap = 64 << 20
        elif any(v in kind for v in ("v4", "v5", "v6")):
            vmem_cap = 128 << 20
        else:
            vmem_cap = 64 << 20  # conservative default when detection fails

    # Scoped VMEM limit with headroom left for the compiler.
    vmem_limit = max(32 << 20, min(vmem_cap * 3 // 4, vmem_cap - (16 << 20)))
    return {"is_v7x": is_v7x, "vmem_cap": vmem_cap, "vmem_limit": int(vmem_limit)}


def _largest_aligned_divisor(total, align, cap):
    """Largest multiple of `align` dividing `total`, bounded by min(total, cap)."""
    best = align
    u = 1
    while u * align <= min(total, cap):
        if total % (u * align) == 0:
            best = u * align
        u += 1
    return best


def _pick_tile_k(D, target, align=512):
    """Pick (tile_k, d_pad); prefer tile_k | d_pad so no zero W rows are streamed."""
    d_align = _round_up(D, align)
    target = max(align, (target // align) * align)
    if d_align <= target:
        return d_align, d_align
    best = _largest_aligned_divisor(d_align, align, target)
    if best * 2 >= target:            # divisor close to target -> zero-waste path
        return best, d_align
    k_steps = _cdiv(d_align, target)  # fallback: equal chunks, minimal padding
    tile_k = _round_up(_cdiv(d_align, k_steps), align)
    return tile_k, tile_k * k_steps


# -----------------------------------------------------------------------------
# Kernel: tiled x @ W + b, accumulating in-place in the resident f32 output.
# -----------------------------------------------------------------------------
def _fused_linear_kernel(x_ref, w_ref, b_ref, o_ref):
    k = pl.program_id(2)

    @pl.when(k == 0)
    def _init():
        o_ref[...] = jnp.zeros_like(o_ref)

    o_ref[...] += jnp.dot(x_ref[...], w_ref[...],
                          preferred_element_type=jnp.float32)

    @pl.when(k == pl.num_programs(2) - 1)
    def _finalize():
        o_ref[...] = o_ref[...] + b_ref[...]


# -----------------------------------------------------------------------------
# One-time parameter prep (call OUTSIDE the query loop and cache the result).
# -----------------------------------------------------------------------------
def prepare_classifier_params(weight, bias, im_mean, im_std, image_shape,
                              weight_layout="auto", weight_dtype=jnp.bfloat16,
                              tile_k=None, tile_n=None, tile_b=256):
    """Fold normalization into (W, b), pad, cast, and pick per-chip tiles.

    `weight` may be [D, n_class] or torch nn.Linear's [n_class, D]
    (auto-detected; pass weight_layout="in_out"/"out_in" to force).
    """
    C, H, W = image_shape
    D = C * H * W
    weight = jnp.asarray(weight, jnp.float32)
    bias = jnp.asarray(bias, jnp.float32)
    if weight.ndim != 2:
        raise ValueError(f"expected 2-D classifier weight, got {weight.shape}")

    if weight_layout == "auto":
        if weight.shape[0] == D:
            weight_layout = "in_out"          # (square-D case defaults here)
        elif weight.shape[1] == D:
            weight_layout = "out_in"          # torch nn.Linear: [out, in]
        else:
            raise ValueError(f"weight shape {weight.shape} incompatible with D={D}")
    if weight_layout == "out_in":
        weight = weight.T
    assert weight.shape[0] == D, (weight.shape, D)
    n_class = weight.shape[1]
    assert bias.shape == (n_class,), (bias.shape, n_class)

    # Same guard as the torch module: normalize only if BOTH stats are given.
    if im_mean is not None and im_std is not None:
        mean_vec = jnp.repeat(jnp.asarray(im_mean, jnp.float32), H * W)          # [D]
        inv_std_vec = 1.0 / jnp.repeat(jnp.asarray(im_std, jnp.float32), H * W)  # [D]
        w_eff = weight * inv_std_vec[:, None]
        b_eff = bias - (mean_vec * inv_std_vec) @ weight
    else:
        w_eff = weight
        b_eff = bias

    profile = _chip_profile()
    weight_dtype = jnp.dtype(weight_dtype)
    w_bytes = weight_dtype.itemsize
    tile_b_cap = _round_up(max(8, int(tile_b)), 8)

    # --- output-column (N) tiling --------------------------------------------
    if tile_n is None:
        n_pad = _round_up(n_class, 128)
        # v7x: keep >=2 parallel j tiles when possible so both TensorCores each
        # stream half of W; v5e/v6e (single TC): one big lane-dense j tile.
        n_cap = 512 if profile["is_v7x"] else 2048
        tile_n = _largest_aligned_divisor(n_pad, 128, n_cap)
    else:
        tile_n = _round_up(int(tile_n), 128)
        n_pad = _round_up(n_class, tile_n)

    # --- reduction (K) tiling, VMEM-budgeted ----------------------------------
    if tile_k is None:
        budget = profile["vmem_limit"] // 2            # double-buffered W + x streams
        per_unit = 2 * w_bytes * (tile_n + tile_b_cap)  # bytes per unit of tile_k
        target = max(512, min(16384, (budget // per_unit) // 512 * 512))
        tile_k, d_pad = _pick_tile_k(D, target)
    else:
        tile_k = _round_up(int(tile_k), 128)
        d_pad = _round_up(D, tile_k)

    w_p = jnp.zeros((d_pad, n_pad), weight_dtype).at[:D, :n_class].set(
        w_eff.astype(weight_dtype))
    b_p = jnp.zeros((1, n_pad), jnp.float32).at[0, :n_class].set(b_eff)

    return dict(w=w_p, b=b_p, D=D, n_class=n_class, d_pad=d_pad, n_pad=n_pad,
                tile_k=int(tile_k), tile_n=int(tile_n), tile_b_cap=tile_b_cap,
                vmem_limit=profile["vmem_limit"], image_shape=(C, H, W))


# -----------------------------------------------------------------------------
# Jitted padded forward (pad + cast + kernel + slice in one XLA dispatch).
# -----------------------------------------------------------------------------
@functools.partial(
    jax.jit,
    static_argnames=("n_class", "b_pad", "d_pad", "n_pad",
                     "tile_b", "tile_k", "tile_n", "vmem_limit"))
def _forward_padded(x_flat, w, b, *, n_class, b_pad, d_pad, n_pad,
                    tile_b, tile_k, tile_n, vmem_limit):
    B, D = x_flat.shape
    comp_dtype = w.dtype

    # Pad + cast to the compute dtype in one fused op (skipped entirely when
    # the caller already supplies aligned input of the right dtype).
    if (B, D) == (b_pad, d_pad) and x_flat.dtype == comp_dtype:
        x_p = x_flat
    else:
        x_p = jnp.zeros((b_pad, d_pad), comp_dtype).at[:B, :D].set(
            x_flat.astype(comp_dtype))

    grid = (b_pad // tile_b, n_pad // tile_n, d_pad // tile_k)

    logits_p = pl.pallas_call(
        _fused_linear_kernel,
        out_shape=jax.ShapeDtypeStruct((b_pad, n_pad), jnp.float32),
        grid_spec=pltpu.PrefetchScalarGridSpec(
            num_scalar_prefetch=0,
            grid=grid,
            in_specs=[
                pl.BlockSpec((tile_b, tile_k), lambda bi, j, k: (bi, k)),  # x tile
                pl.BlockSpec((tile_k, tile_n), lambda bi, j, k: (k, j)),   # W tile
                pl.BlockSpec((1, tile_n), lambda bi, j, k: (0, j)),        # bias tile
            ],
            out_specs=pl.BlockSpec((tile_b, tile_n), lambda bi, j, k: (bi, j)),
        ),
        compiler_params=pltpu.CompilerParams(
            dimension_semantics=("parallel", "parallel", "arbitrary"),
            vmem_limit_bytes=vmem_limit),
    )(x_p, w, b)

    return logits_p[:B, :n_class]


def general_torch_model_forward(image, params):
    """JAX/Pallas equivalent of GeneralTorchModel.forward with prepared params.

    NOTE: in attack loops, batch candidate queries so B >> 8 per call — W is
    re-streamed from HBM every call and is the dominant cost at small B.
    """
    image = jnp.asarray(image)
    if image.ndim == 3:                       # matches torch `image.unsqueeze(0)`
        image = image[None, ...]
    if image.ndim != 4:
        raise ValueError(f"expected CHW or NCHW image, got shape {image.shape}")

    C, H, W = params["image_shape"]
    B = image.shape[0]
    x_flat = image.reshape(B, C * H * W)      # row-major NCHW flatten == x.view(B, -1)

    tile_b = min(_round_up(max(B, 8), 8), params["tile_b_cap"])
    b_pad = _round_up(max(B, 8), tile_b)

    return _forward_padded(
        x_flat, params["w"], params["b"],
        n_class=params["n_class"], b_pad=b_pad, d_pad=params["d_pad"],
        n_pad=params["n_pad"], tile_b=tile_b, tile_k=params["tile_k"],
        tile_n=params["tile_n"], vmem_limit=params["vmem_limit"])


def predict_label(image, params):
    """Equivalent of GeneralTorchModel.predict_label (argmax over class axis)."""
    # TODO(synk): the module's `num_queries` counter is host-side Python state,
    # not kernel work; it is intentionally not modeled here.
    logits = general_torch_model_forward(image, params)
    return jnp.argmax(logits, axis=1)


if __name__ == "__main__":
    key = jax.random.PRNGKey(0)
    k_img, k_w, k_b = jax.random.split(key, 3)

    # Small shapes consistent with the module's NCHW image input.
    B, C, H, W = 2, 4, 16, 16
    n_class = 10
    D = C * H * W

    image = jax.random.uniform(k_img, (B, C, H, W), dtype=jnp.float32)
    im_mean = jnp.array([0.485, 0.456, 0.406, 0.450], dtype=jnp.float32)
    im_std = jnp.array([0.229, 0.224, 0.225, 0.230], dtype=jnp.float32)
    weight_in_out = jax.random.normal(k_w, (D, n_class), dtype=jnp.float32) * 0.02
    bias = jax.random.normal(k_b, (n_class,), dtype=jnp.float32) * 0.01

    # Reference 1: exact f32 semantics of the PyTorch module.
    mean_b = im_mean.reshape(1, C, 1, 1)
    std_b = im_std.reshape(1, C, 1, 1)
    ref_f32 = ((image - mean_b) / std_b).reshape(B, D) @ weight_in_out + bias

    # Reference 2: identical folded-bf16 math as the kernel.
    inv = 1.0 / jnp.repeat(im_std, H * W)
    w_eff_ref = (weight_in_out * inv[:, None]).astype(jnp.bfloat16)
    b_eff_ref = bias - (jnp.repeat(im_mean, H * W) * inv) @ weight_in_out
    ref_bf16 = jnp.dot(image.reshape(B, D).astype(jnp.bfloat16), w_eff_ref,
                       preferred_element_type=jnp.float32) + b_eff_ref

    # --- config 1: auto per-chip tiles; torch nn.Linear layout [n_class, D] ----
    params = prepare_classifier_params(weight_in_out.T, bias, im_mean, im_std,
                                       (C, H, W))
    logits = jax.block_until_ready(general_torch_model_forward(image, params))
    assert logits.shape == (B, n_class)
    assert jnp.allclose(logits, ref_f32, atol=1e-1, rtol=1e-1), float(
        jnp.max(jnp.abs(logits - ref_f32)))
    assert jnp.allclose(logits, ref_bf16, atol=2e-3, rtol=2e-3), float(
        jnp.max(jnp.abs(logits - ref_bf16)))

    # --- config 2: forced multi-step K reduction (exercises the in-place
    # accumulate-into-output path across k), [D, n_class] layout ---------------
    params_k = prepare_classifier_params(weight_in_out, bias, im_mean, im_std,
                                         (C, H, W), tile_k=256, tile_n=128)
    logits_k = jax.block_until_ready(general_torch_model_forward(image, params_k))
    assert logits_k.shape == (B, n_class)
    assert jnp.allclose(logits_k, ref_bf16, atol=2e-3, rtol=2e-3), float(
        jnp.max(jnp.abs(logits_k - ref_bf16)))
    assert jnp.allclose(logits_k, ref_f32, atol=1e-1, rtol=1e-1), float(
        jnp.max(jnp.abs(logits_k - ref_f32)))

    labels = jax.block_until_ready(predict_label(image, params))
    assert labels.shape == (B,)

    print("KERNEL_OK")
</pallas_src>

<mosaic_0001>
module attributes {stable_mosaic.version = 11 : i64} {
  func.func @_fused_linear_kernel(%arg0: i32, %arg1: i32, %arg2: i32, %arg3: memref<8x1024xbf16, #tpu.memory_space<vmem>>, %arg4: memref<1024x128xbf16, #tpu.memory_space<vmem>>, %arg5: memref<1x128xf32, #tpu.memory_space<vmem>>, %arg6: memref<8x128xf32, #tpu.memory_space<vmem>>) attributes {dimension_semantics = [#tpu.dimension_semantics<parallel>, #tpu.dimension_semantics<parallel>, #tpu.dimension_semantics<arbitrary>], iteration_bounds = array<i64: 1, 1, 1>, scalar_prefetch = 0 : i64, scratch_operands = 0 : i64, tpu.core_type = #tpu.core_type<tc>, window_params = [{transform_indices = @transform_0, window_bounds = array<i64: 8, 1024>}, {transform_indices = @transform_1, window_bounds = array<i64: 1024, 128>}, {transform_indices = @transform_2, window_bounds = array<i64: 1, 128>}, {transform_indices = @transform_3, window_bounds = array<i64: 8, 128>}]} {
    %c0_i32 = arith.constant 0 : i32
    %0 = arith.cmpi eq, %arg2, %c0_i32 : i32
    %1 = arith.extui %0 : i1 to i32
    %c0_i32_0 = arith.constant 0 : i32
    %2 = arith.cmpi ne, %1, %c0_i32_0 : i32
    scf.if %2 {
      %cst_10 = arith.constant 0.000000e+00 : f32
      %12 = vector.broadcast %cst_10 : f32 to vector<8x128xf32>
      %c0_11 = arith.constant 0 : index
      %c0_12 = arith.constant 0 : index
      %13 = vector.load %arg6[%c0_11, %c0_12] : memref<8x128xf32, #tpu.memory_space<vmem>>, vector<8x128xf32>
      tpu.vector_store %arg6[%c0_11, %c0_12], %12 {strides = array<i32>} : memref<8x128xf32, #tpu.memory_space<vmem>>, vector<8x128xf32>,
    } else {
    }
    %c0 = arith.constant 0 : index
    %c0_1 = arith.constant 0 : index
    %3 = vector.load %arg6[%c0, %c0_1] : memref<8x128xf32, #tpu.memory_space<vmem>>, vector<8x128xf32>
    %c0_2 = arith.constant 0 : index
    %c0_3 = arith.constant 0 : index
    %4 = vector.load %arg3[%c0_2, %c0_3] : memref<8x1024xbf16, #tpu.memory_space<vmem>>, vector<8x1024xbf16>
    %c0_4 = arith.constant 0 : index
    %c0_5 = arith.constant 0 : index
    %5 = vector.load %arg4[%c0_4, %c0_5] : memref<1024x128xbf16, #tpu.memory_space<vmem>>, vector<1024x128xbf16>
    %cst = arith.constant dense<0.000000e+00> : vector<8x128xf32>
    %6 = tpu.matmul %4, %5, %cst {dimension_numbers = #tpu.dot_dimension_numbers<[1], [0], [0], [1], [0, 0, 1, 1], [], []>} : vector<8x1024xbf16>, vector<1024x128xbf16>, vector<8x128xf32> -> vector<8x128xf32>
    %7 = arith.addf %3, %6 : vector<8x128xf32>
    %c0_6 = arith.constant 0 : index
    %c0_7 = arith.constant 0 : index
    %8 = vector.load %arg6[%c0_6, %c0_7] : memref<8x128xf32, #tpu.memory_space<vmem>>, vector<8x128xf32>
    tpu.vector_store %arg6[%c0_6, %c0_7], %7 {strides = array<i32>} : memref<8x128xf32, #tpu.memory_space<vmem>>, vector<8x128xf32>,
    %c0_i32_8 = arith.constant 0 : i32
    %9 = arith.cmpi eq, %arg2, %c0_i32_8 : i32
    %10 = arith.extui %9 : i1 to i32
    %c0_i32_9 = arith.constant 0 : i32
    %11 = arith.cmpi ne, %10, %c0_i32_9 : i32
    scf.if %11 {
      %c0_10 = arith.constant 0 : index
      %c0_11 = arith.constant 0 : index
      %12 = vector.load %arg6[%c0_10, %c0_11] : memref<8x128xf32, #tpu.memory_space<vmem>>, vector<8x128xf32>
      %c0_12 = arith.constant 0 : index
      %c0_13 = arith.constant 0 : index
      %13 = vector.load %arg5[%c0_12, %c0_13] : memref<1x128xf32, #tpu.memory_space<vmem>>, vector<1x128xf32>
      %14 = vector.broadcast %13 : vector<1x128xf32> to vector<8x128xf32>
      %15 = arith.addf %12, %14 : vector<8x128xf32>
      %c0_14 = arith.constant 0 : index
      %c0_15 = arith.constant 0 : index
      %16 = vector.load %arg6[%c0_14, %c0_15] : memref<8x128xf32, #tpu.memory_space<vmem>>, vector<8x128xf32>
      tpu.vector_store %arg6[%c0_14, %c0_15], %15 {strides = array<i32>} : memref<8x128xf32, #tpu.memory_space<vmem>>, vector<8x128xf32>,
    } else {
    }
    return
  }
  func.func @transform_0(%arg0: i32, %arg1: i32, %arg2: i32) -> (i32, i32) {
    %c0_i32 = arith.constant 0 : i32
    return %arg0, %arg2 : i32, i32
  }
  func.func @transform_1(%arg0: i32, %arg1: i32, %arg2: i32) -> (i32, i32) {
    %c0_i32 = arith.constant 0 : i32
    return %arg2, %arg1 : i32, i32
  }
  func.func @transform_2(%arg0: i32, %arg1: i32, %arg2: i32) -> (i32, i32) {
    %c0_i32 = arith.constant 0 : i32
    %c0_i32_0 = arith.constant 0 : i32
    return %c0_i32, %arg1 : i32, i32
  }
  func.func @transform_3(%arg0: i32, %arg1: i32, %arg2: i32) -> (i32, i32) {
    %c0_i32 = arith.constant 0 : i32
    return %arg0, %arg1 : i32, i32
  }
}

</mosaic_0001>

<bundles_post_ra>
// kernel: _forward_padded.1
= control target key start
LH: loop header
LB: loop body
LE: loop exit
PB: predicated region body
PF: predicated region fallthrough
CT: control target
= control target key end

     0   :  { %8 = vsyncpa [#allocation3], 0  ;;  %s1018_s12 = smov [#allocation2]   ;;  %s1062_s0 = inlined_call_operand.vmem [shape: bf16[8,1024], index: 0, kind: input, shape index: {}]   ;;  %s1063_s1 = inlined_call_operand.hbm [shape: bf16[1024,128], index: 1, kind: input, shape index: {}]   ;;  %s1064_s2 = inlined_call_operand.vmem [shape: f32[1,128], index: 2, kind: input, shape index: {}]   ;;  %s1065_s3 = inlined_call_operand.vmem [shape: f32[8,128], index: 3, kind: output, shape index: {}]  }
   0x1   :  { %s16_s13 = sshll.u32 %s1018_s12, 4  ;;  %s17_s13 = int_to_ptr.vmem [resolvable:$true] %s16_s13 }
   0x2   :  { %s1004_s14 = scalar_lea.vmem %s17_s13, 8192  ;;  %p1009_p1 = scmp.lt.s32.totalorder %s17_s13, %s17_s13 }
   0x3   :  { %p1005_p0 = scmp.ne.s32.totalorder %s17_s13, %s1004_s14  ;;  %p1010_p2 = scmp.lt.s32.totalorder %s1004_s14, %s1004_s14 }
   0x5   :  { %p1011_p3 = por %p1010_p2, %p1009_p1 }
   0x7   :  { %p1012_p4 = pnand %p1011_p3, %p1005_p0 }
   0x9   :  { %1015 = shalt.err (!%p1012_p4)
}
   0xa   :  { %s1019_s15 = smov 64   ;;  %s1020_s16 = smov 4  }
   0xb   :  { %22 = dma.hbm_to_vmem [thread:$0]  %s1063_s1, 8192, %s17_s13, [#allocation3], %s1019_s15, %s1019_s15, %s1020_s16  }
   0xc   :  { %1016 = dma.done.wait [#allocation3], 8192  }
   0xd   :  { %1017 = vsyncadd [#allocation3], 4294959104  ;;  %v924_v0 = vld [vmem:[#allocation2 + $0x78] sm:$0xff]   ;;  %v928_v4 = vld [vmem:[#allocation2 + $0x70] sm:$0xff]  }
   0xe   :  { %v925_v1 = vld [vmem:[#allocation2 + $0xf8] sm:$0xff]   ;;  %832 = vmatprep.subr.bf16.mxu0 %v924_v0  ;;  %v929_v5 = vld [vmem:[#allocation2 + $0xf0] sm:$0xff]   ;;  %v932_v8 = vld [vmem:[#allocation2 + $0x68] sm:$0xff]  }
   0xf   :  { %v926_v2 = vld [vmem:[#allocation2 + $0x38] sm:$0xff]   ;;  %854 = vmatprep.subr.bf16.mxu1 %v925_v1  ;;  %v930_v6 = vld [vmem:[#allocation2 + $0x30] sm:$0xff]   ;;  %v933_v9 = vld [vmem:[#allocation2 + $0xe8] sm:$0xff]  }
  0x10   :  { %v927_v3 = vld [vmem:[#allocation2 + $0xb8] sm:$0xff]   ;;  %833 = vmatpush3.bf16.msra.mxu0 %v926_v2  ;;  %v931_v7 = vld [vmem:[#allocation2 + $0xb0] sm:$0xff]   ;;  %v934_v10 = vld [vmem:[#allocation2 + $0x28] sm:$0xff]  }
  0x11   :  { %855 = vmatpush3.bf16.msra.mxu1 %v927_v3  ;;  %834 = vmatprep.subr.bf16.mxu0 %v928_v4  ;;  %v935_v11 = vld [vmem:[#allocation2 + $0xa8] sm:$0xff]   ;;  %v936_v12 = vld [vmem:[#allocation2 + $0x60] sm:$0xff]   ;;  %v940_v16 = vld [vmem:[#allocation2 + $0x58] sm:$0xff]  }
  0x12   :  { %856 = vmatprep.subr.bf16.mxu1 %v929_v5  ;;  %v937_v13 = vld [vmem:[#allocation2 + $0xe0] sm:$0xff]   ;;  %v941_v17 = vld [vmem:[#allocation2 + $0xd8] sm:$0xff]   ;;  %v944_v20 = vld [vmem:[#allocation2 + $0x50] sm:$0xff]  }
  0x13   :  { %v938_v14 = vld [vmem:[#allocation2 + $0x20] sm:$0xff]   ;;  %v942_v18 = vld [vmem:[#allocation2 + $0x18] sm:$0xff]   ;;  %v945_v21 = vld [vmem:[#allocation2 + $0xd0] sm:$0xff]  }
  0x14   :  { %835 = vmatpush3.bf16.msra.mxu0 %v930_v6  ;;  %v939_v15 = vld [vmem:[#allocation2 + $0xa0] sm:$0xff]   ;;  %v943_v19 = vld [vmem:[#allocation2 + $0x98] sm:$0xff]   ;;  %v946_v22 = vld [vmem:[#allocation2 + $0x10] sm:$0xff]  }
  0x15   :  { %857 = vmatpush3.bf16.msra.mxu1 %v931_v7  ;;  %836 = vmatprep.subr.bf16.mxu0 %v932_v8  ;;  %v947_v23 = vld [vmem:[#allocation2 + $0x90] sm:$0xff]   ;;  %v948_v24 = vld [vmem:[#allocation2 + $0x48] sm:$0xff]   ;;  %v952_v28 = vld [vmem:[#allocation2 + $0x40] sm:$0xff]  }
  0x16   :  { %858 = vmatprep.subr.bf16.mxu1 %v933_v9  ;;  %v949_v25 = vld [vmem:[#allocation2 + $0xc8] sm:$0xff]   ;;  %v953_v29 = vld [vmem:[#allocation2 + $0xc0] sm:$0xff]   ;;  %v960_v38 = vld [vmem:[#allocation2 + $0x178] sm:$0xff]  }
  0x17   :  { %v950_v26 = vld [vmem:[#allocation2 + $0x8] sm:$0xff]   ;;  %v954_v30 = vld [vmem:[#allocation2] sm:$0xff]   ;;  %v961_v39 = vld [vmem:[#allocation2 + $0x1f8] sm:$0xff]  }
  0x18   :  { %837 = vmatpush3.bf16.msra.mxu0 %v934_v10  ;;  %v951_v27 = vld [vmem:[#allocation2 + $0x88] sm:$0xff]   ;;  %v955_v31 = vld [vmem:[#allocation2 + $0x80] sm:$0xff]   ;;  %v962_v40 = vld [vmem:[#allocation2 + $0x138] sm:$0xff]  }
  0x19   :  { %859 = vmatpush3.bf16.msra.mxu1 %v935_v11  ;;  %838 = vmatprep.subr.bf16.mxu0 %v936_v12  ;;  %v35_v32 = vld [vmem:[%s1062_s0] sm:$0xff]  ;;  %v36_v33 = vld [vmem:[%s1062_s0 + $0x8] sm:$0xff]  ;;  %v963_v41 = vld [vmem:[#allocation2 + $0x1b8] sm:$0xff]  }
  0x1a   :  { %860 = vmatprep.subr.bf16.mxu1 %v937_v13  ;;  %v759_v34 = vcombine.low %v35_v32, %v35_v32  ;;  %v760_v35 = vcombine.high %v35_v32, %v35_v32  ;;  %v761_v36 = vcombine.low %v36_v33, %v36_v33  ;;  %v762_v37 = vcombine.high %v36_v33, %v36_v33  ;;  %v964_v42 = vld [vmem:[#allocation2 + $0x170] sm:$0xff]   ;;  %v968_v46 = vld [vmem:[#allocation2 + $0x168] sm:$0xff]   ;;  %v972_v50 = vld [vmem:[#allocation2 + $0x160] sm:$0xff]  }
  0x1b   :  { %v965_v43 = vld [vmem:[#allocation2 + $0x1f0] sm:$0xff]   ;;  %v969_v47 = vld [vmem:[#allocation2 + $0x1e8] sm:$0xff]   ;;  %v973_v51 = vld [vmem:[#allocation2 + $0x1e0] sm:$0xff]  }
  0x1c   :  { %839 = vmatpush3.bf16.msra.mxu0 %v938_v14  ;;  %611 = vmatprep.mubr.bf16.mxu0 %v760_v35  ;;  %v966_v44 = vld [vmem:[#allocation2 + $0x130] sm:$0xff]   ;;  %v970_v48 = vld [vmem:[#allocation2 + $0x128] sm:$0xff]   ;;  %v974_v52 = vld [vmem:[#allocation2 + $0x120] sm:$0xff]  }
  0x1d   :  { %861 = vmatpush3.bf16.msra.mxu1 %v939_v15  ;;  %840 = vmatprep.subr.bf16.mxu0 %v940_v16  ;;  %v967_v45 = vld [vmem:[#allocation2 + $0x1b0] sm:$0xff]   ;;  %v971_v49 = vld [vmem:[#allocation2 + $0x1a8] sm:$0xff]   ;;  %v975_v53 = vld [vmem:[#allocation2 + $0x1a0] sm:$0xff]  }
  0x1e   :  { %862 = vmatprep.subr.bf16.mxu1 %v941_v17  ;;  %651 = vmatprep.mubr.bf16.mxu1 %v762_v37  ;;  %v976_v54 = vld [vmem:[#allocation2 + $0x158] sm:$0xff]   ;;  %v980_v58 = vld [vmem:[#allocation2 + $0x150] sm:$0xff]   ;;  %v984_v62 = vld [vmem:[#allocation2 + $0x148] sm:$0xff]  }
  0x1f   :  { %v977_v55 = vld [vmem:[#allocation2 + $0x1d8] sm:$0xff]   ;;  %v981_v59 = vld [vmem:[#allocation2 + $0x1d0] sm:$0xff]   ;;  %v985_v63 = vld [vmem:[#allocation2 + $0x1c8] sm:$0xff]  }
  0x20   :  { %841 = vmatpush3.bf16.msra.mxu0 %v942_v18  ;;  %v978_v56 = vld [vmem:[#allocation2 + $0x118] sm:$0xff]   ;;  %v982_v60 = vld [vmem:[#allocation2 + $0x110] sm:$0xff]   ;;  %v986_v0 = vld [vmem:[#allocation2 + $0x108] sm:$0xff]  }
  0x21   :  { %863 = vmatpush3.bf16.msra.mxu1 %v943_v19  ;;  %842 = vmatprep.subr.bf16.mxu0 %v944_v20  ;;  %v979_v57 = vld [vmem:[#allocation2 + $0x198] sm:$0xff]   ;;  %v983_v61 = vld [vmem:[#allocation2 + $0x190] sm:$0xff]   ;;  %v987_v1 = vld [vmem:[#allocation2 + $0x188] sm:$0xff]  }
  0x22   :  { %864 = vmatprep.subr.bf16.mxu1 %v945_v21  ;;  %v988_v2 = vld [vmem:[#allocation2 + $0x140] sm:$0xff]   ;;  %v37_v6 = vld [vmem:[%s1062_s0 + $0x10] sm:$0xff]  ;;  %v38_v9 = vld [vmem:[%s1062_s0 + $0x18] sm:$0xff] }
  0x23   :  { %v989_v3 = vld [vmem:[#allocation2 + $0x1c0] sm:$0xff]   ;;  %v763_v7 = vcombine.low %v37_v6, %v37_v6  ;;  %v764_v8 = vcombine.high %v37_v6, %v37_v6  ;;  %v765_v10 = vcombine.low %v38_v9, %v38_v9  ;;  %v766_v11 = vcombine.high %v38_v9, %v38_v9 }
  0x24   :  { %843 = vmatpush3.bf16.msra.mxu0 %v946_v22  ;;  %v990_v4 = vld [vmem:[#allocation2 + $0x100] sm:$0xff]  }
  0x25   :  { %865 = vmatpush3.bf16.msra.mxu1 %v947_v23  ;;  %844 = vmatprep.subr.bf16.mxu0 %v948_v24  ;;  %v991_v5 = vld [vmem:[#allocation2 + $0x180] sm:$0xff]  }
  0x26   :  { %866 = vmatprep.subr.bf16.mxu1 %v949_v25  ;;  %v831_v35 = vld [vmem:[%s1064_s2] ss:$0 sm:$0xff] }
  0x28   :  { %845 = vmatpush3.bf16.msra.mxu0 %v950_v26 }
  0x29   :  { %867 = vmatpush3.bf16.msra.mxu1 %v951_v27  ;;  %846 = vmatprep.subr.bf16.mxu0 %v952_v28 }
  0x2a   :  { %868 = vmatprep.subr.bf16.mxu1 %v953_v29 }
  0x2c   :  { %847 = vmatpush3.bf16.msra.mxu0 %v954_v30 }
  0x2d   :  { %869 = vmatpush3.bf16.msra.mxu1 %v955_v31  ;;  %876 = vmatprep.subr.bf16.mxu0 %v960_v38 }
  0x2e   :  { %898 = vmatprep.subr.bf16.mxu1 %v961_v39 }
  0x2f   :  { %612 = vmatmul.mubr.bf16.vlgmr.msra.gmra.mxu0 %v759_v34 }
  0x30   :  { %652 = vmatmul.mubr.bf16.vlgmr.msra.gmra.mxu1 %v761_v36  ;;  %877 = vmatpush3.bf16.msra.mxu0 %v962_v40 }
  0x31   :  { %899 = vmatpush3.bf16.msra.mxu1 %v963_v41  ;;  %878 = vmatprep.subr.bf16.mxu0 %v964_v42 }
  0x32   :  { %900 = vmatprep.subr.bf16.mxu1 %v965_v43  ;;  %691 = vmatprep.mubr.bf16.mxu0 %v764_v8 }
  0x33   :  { %731 = vmatprep.mubr.bf16.mxu1 %v766_v11 }
  0x34   :  { %879 = vmatpush3.bf16.msra.mxu0 %v966_v44 }
  0x35   :  { %901 = vmatpush3.bf16.msra.mxu1 %v967_v45  ;;  %880 = vmatprep.subr.bf16.mxu0 %v968_v46 }
  0x36   :  { %902 = vmatprep.subr.bf16.mxu1 %v969_v47 }
  0x38   :  { %881 = vmatpush3.bf16.msra.mxu0 %v970_v48 }
  0x39   :  { %903 = vmatpush3.bf16.msra.mxu1 %v971_v49  ;;  %882 = vmatprep.subr.bf16.mxu0 %v972_v50 }
  0x3a   :  { %904 = vmatprep.subr.bf16.mxu1 %v973_v51 }
  0x3c   :  { %883 = vmatpush3.bf16.msra.mxu0 %v974_v52 }
  0x3d   :  { %905 = vmatpush3.bf16.msra.mxu1 %v975_v53  ;;  %884 = vmatprep.subr.bf16.mxu0 %v976_v54 }
  0x3e   :  { %906 = vmatprep.subr.bf16.mxu1 %v977_v55 }
  0x40   :  { %885 = vmatpush3.bf16.msra.mxu0 %v978_v56 }
  0x41   :  { %907 = vmatpush3.bf16.msra.mxu1 %v979_v57  ;;  %886 = vmatprep.subr.bf16.mxu0 %v980_v58 }
  0x42   :  { %908 = vmatprep.subr.bf16.mxu1 %v981_v59 }
  0x44   :  { %887 = vmatpush3.bf16.msra.mxu0 %v982_v60 }
  0x45   :  { %909 = vmatpush3.bf16.msra.mxu1 %v983_v61  ;;  %888 = vmatprep.subr.bf16.mxu0 %v984_v62 }
  0x46   :  { %910 = vmatprep.subr.bf16.mxu1 %v985_v63 }
  0x48   :  { %889 = vmatpush3.bf16.msra.mxu0 %v986_v0 }
  0x49   :  { %911 = vmatpush3.bf16.msra.mxu1 %v987_v1  ;;  %890 = vmatprep.subr.bf16.mxu0 %v988_v2 }
  0x4a   :  { %912 = vmatprep.subr.bf16.mxu1 %v989_v3 }
  0x4c   :  { %891 = vmatpush3.bf16.msra.mxu0 %v990_v4 }
  0x4d   :  { %913 = vmatpush3.bf16.msra.mxu1 %v991_v5 }
  0x4f   :  { %692 = vmatmul.mubr.bf16.vlgmr.msra.gmra.mxu0 %v763_v7 }
  0x50   :  { %732 = vmatmul.mubr.bf16.vlgmr.msra.gmra.mxu1 %v765_v10 }
  0xef   :  { %v848_v12 = vpop.f32.mrf.mxu0 }
  0xf0   :  { %v870_v13 = vpop.f32.mrf.mxu1 }
  0xf1   :  { %v849_v14 = vpop.f32.mrf.mxu0 }
  0xf2   :  { %v871_v15 = vpop.f32.mrf.mxu1  ;;  %v850_v20 = vadd.f32 %v849_v14, %v848_v12 }
  0xf3   :  { %v851_v16 = vpop.f32.mrf.mxu0  ;;  %v872_v21 = vadd.f32 %v871_v15, %v870_v13 }
  0xf4   :  { %v873_v17 = vpop.f32.mrf.mxu1 }
  0xf5   :  { %v852_v18 = vpop.f32.mrf.mxu0  ;;  %v654_v26 = vadd.f32 %v872_v21, %v850_v20 }
  0xf6   :  { %v874_v19 = vpop.f32.mrf.mxu1 }
 0x10f   :  { %v892_v22 = vpop.f32.mrf.mxu0 }
 0x110   :  { %v914_v23 = vpop.f32.mrf.mxu1 }
 0x111   :  { %v893_v24 = vpop.f32.mrf.mxu0 }
 0x112   :  { %v915_v25 = vpop.f32.mrf.mxu1  ;;  %v894_v27 = vadd.f32 %v893_v24, %v892_v22 }
 0x113   :  { %v895_v28 = vpop.f32.mrf.mxu0  ;;  %v916_v31 = vadd.f32 %v915_v25, %v914_v23 }
 0x114   :  { %v917_v29 = vpop.f32.mrf.mxu1  ;;  %v694_v30 = vadd.f32 %v894_v27, %v654_v26 }
 0x115   :  { %v896_v32 = vpop.f32.mrf.mxu0 }
 0x116   :  { %v918_v33 = vpop.f32.mrf.mxu1  ;;  %v734_v34 = vadd.f32 %v916_v31, %v694_v30 }
 0x118   :  { %v752_v36 = vadd.f32 %v831_v35, %v734_v34 }
 0x11a   :  { %753 = vst [vmem:[%s1065_s3] sm:$0xff] %v752_v36 }
 0x11b   :  { %758 = vsyncpa [#allocation3], 1 }

</bundles_post_ra>
